<compile_context>
chip_gen: v7x
topology: tpu7x:2x2x1
jax: 0.10.0
libtpu: 0.0.40
codegen_flags: <defaults>
</compile_context>

<pallas_src>
import functools

import jax
import jax.numpy as jnp
from jax.experimental import pallas as pl
from jax.experimental.pallas import tpu as pltpu


def _round_up(n: int, m: int) -> int:
    return ((n + m - 1) // m) * m


def _pick_batch_tile(batch: int):
    """Pick (TB, Bp): batch tile and padded batch size.

    Prefer the largest tile (fewest grid steps / best HBM streaming) whose
    padding waste is small, and >=2 grid steps so both v7x TensorCores get
    work.  TB is always a multiple of 8 (f32 sublane tile).
    """
    candidates = (1024, 512, 256, 128, 64, 32, 16, 8)
    best = None
    for tb in candidates:
        bp = _round_up(batch, tb)
        steps = bp // tb
        waste = bp - batch
        score = (
            waste > max(batch // 4, 8),  # avoid >~25% batch padding
            steps < 2,                   # keep both v7x TCs busy when possible
            steps,                       # then: fewest grid steps
            waste,                       # then: least padding
        )
        if best is None or score < best[0]:
            best = (score, tb, bp)
    return best[1], best[2]


def prepare_params(w1, b1, w2, b2):
    """One-time prep: pad hidden dim to a 128-lane multiple, cast weights to bf16.

    Call once at init; padded zeros are mathematically inert (zero columns of
    W1/b1 produce relu(0)=0 hidden activations that hit zero rows of W2).
    """
    in_dim, feature_dim = w1.shape
    out_dim = w2.shape[1]
    F = _round_up(feature_dim, 128)
    w1p = jnp.pad(w1, ((0, 0), (0, F - feature_dim))).astype(jnp.bfloat16)
    b1p = jnp.pad(b1.reshape(1, -1).astype(jnp.float32),
                  ((0, 0), (0, F - feature_dim)))
    w2p = jnp.pad(w2, ((0, F - feature_dim), (0, 0))).astype(jnp.bfloat16)
    b2p = b2.reshape(1, -1).astype(jnp.float32)
    del in_dim, out_dim
    return w1p, b1p, w2p, b2p


def _mlp_kernel(x_ref, w1_ref, b1_ref, w2_ref, b2_ref, o_ref):
    # x:(TB, in_dim) f32, w1:(in_dim, F) bf16, b1:(1, F) f32,
    # w2:(F, out_dim) bf16, b2:(1, out_dim) f32, o:(TB, out_dim) f32.
    x = x_ref[...].astype(jnp.bfloat16)                       # in-kernel cast (VPU)
    h = jnp.dot(x, w1_ref[...], preferred_element_type=jnp.float32)   # MXU
    h = jnp.maximum(h + b1_ref[...], 0.0)                     # f32 epilogue (VPU)
    y = jnp.dot(h.astype(jnp.bfloat16), w2_ref[...],
                preferred_element_type=jnp.float32)           # MXU
    o_ref[...] = (y + b2_ref[...]).astype(o_ref.dtype)


@jax.jit
def base_classifier_forward(x, w1p, b1p, w2p, b2p):
    """Forward pass; expects params already prepared by `prepare_params`."""
    B, in_dim = x.shape
    F = w1p.shape[1]          # padded hidden dim (lane multiple)
    out_dim = w2p.shape[1]    # real output dim (unpadded)

    TB, Bp = _pick_batch_tile(B)
    xp = x if Bp == B else jnp.pad(x, ((0, Bp - B), (0, 0)))

    cost = pl.CostEstimate(
        flops=2 * Bp * (in_dim * F + F * out_dim),
        transcendentals=0,
        bytes_accessed=(Bp * in_dim * 4 + w1p.size * 2 + w2p.size * 2
                        + b1p.size * 4 + b2p.size * 4 + Bp * out_dim * 4),
    )

    y_pad = pl.pallas_call(
        _mlp_kernel,
        out_shape=jax.ShapeDtypeStruct((Bp, out_dim), jnp.float32),
        grid_spec=pltpu.PrefetchScalarGridSpec(
            num_scalar_prefetch=0,
            grid=(Bp // TB,),                                  # 1-D batch grid
            in_specs=[
                pl.BlockSpec((TB, in_dim), lambda i: (i, 0)),  # x tile (full minor dim)
                pl.BlockSpec((in_dim, F), lambda i: (0, 0)),   # W1 resident
                pl.BlockSpec((1, F), lambda i: (0, 0)),        # b1 resident
                pl.BlockSpec((F, out_dim), lambda i: (0, 0)),  # W2 resident
                pl.BlockSpec((1, out_dim), lambda i: (0, 0)),  # b2 resident
            ],
            out_specs=pl.BlockSpec((TB, out_dim), lambda i: (i, 0)),
        ),
        compiler_params=pltpu.CompilerParams(
            dimension_semantics=("parallel",),  # batch axis shards across v7x TCs
            vmem_limit_bytes=32 * 1024 * 1024,  # safe on v5e/v6e/v7x
        ),
        cost_estimate=cost,
    )(xp, w1p, b1p, w2p, b2p)

    return y_pad if Bp == B else y_pad[:B]


def init_params(key, in_dim, feature_dim, out_dim, dtype=jnp.float32):
    # Mirrors nn.Linear default init: U(-1/sqrt(fan_in), 1/sqrt(fan_in)).
    k1, k2, k3, k4 = jax.random.split(key, 4)
    bound1 = 1.0 / (in_dim ** 0.5)
    bound2 = 1.0 / (feature_dim ** 0.5)
    w1 = jax.random.uniform(k1, (in_dim, feature_dim), dtype, -bound1, bound1)
    b1 = jax.random.uniform(k2, (1, feature_dim), dtype, -bound1, bound1)
    w2 = jax.random.uniform(k3, (feature_dim, out_dim), dtype, -bound2, bound2)
    b2 = jax.random.uniform(k4, (1, out_dim), dtype, -bound2, bound2)
    return w1, b1, w2, b2


if __name__ == "__main__":
    # Small shapes consistent with the module: batch (data) = 10,
    # in_dim = 32, feature_dim = 64, out_dim = 8.
    data, in_dim, feature_dim, out_dim = 10, 32, 64, 8

    key = jax.random.PRNGKey(0)
    kx, kp = jax.random.split(key)
    x = jax.random.normal(kx, (data, in_dim), dtype=jnp.float32)
    w1, b1, w2, b2 = init_params(kp, in_dim, feature_dim, out_dim)

    # One-time param prep (hoisted out of the per-call path).
    params = prepare_params(w1, b1, w2, b2)
    params = jax.tree_util.tree_map(jax.block_until_ready, params)

    y = base_classifier_forward(x, *params)
    jax.block_until_ready(y)
    assert y.shape == (data, out_dim)

    # Reference with the same bf16-matmul / f32-accumulate recipe.
    xb, w1b, w2b = (a.astype(jnp.bfloat16) for a in (x, w1, w2))
    h_ref = jnp.maximum(
        jnp.dot(xb, w1b, preferred_element_type=jnp.float32) + b1, 0.0)
    y_ref = jnp.dot(h_ref.astype(jnp.bfloat16), w2b,
                    preferred_element_type=jnp.float32) + b2
    assert jnp.allclose(y, y_ref, atol=1e-2, rtol=1e-2)

    # Sanity vs. full-f32 math (loose tolerance for bf16 rounding).
    y_f32 = jnp.maximum(x @ w1 + b1, 0.0) @ w2 + b2
    assert jnp.allclose(y, y_f32, atol=5e-2, rtol=5e-2)

    print("KERNEL_OK")
</pallas_src>

<mosaic_0001>
module attributes {stable_mosaic.version = 11 : i64} {
  func.func @_mlp_kernel(%arg0: i32, %arg1: memref<8x32xf32, #tpu.memory_space<vmem>>, %arg2: memref<32x128xbf16, #tpu.memory_space<vmem>>, %arg3: memref<1x128xf32, #tpu.memory_space<vmem>>, %arg4: memref<128x8xbf16, #tpu.memory_space<vmem>>, %arg5: memref<1x8xf32, #tpu.memory_space<vmem>>, %arg6: memref<8x8xf32, #tpu.memory_space<vmem>>) attributes {dimension_semantics = [#tpu.dimension_semantics<parallel>], iteration_bounds = array<i64: 2>, scalar_prefetch = 0 : i64, scratch_operands = 0 : i64, tpu.core_type = #tpu.core_type<tc>, window_params = [{transform_indices = @transform_0, window_bounds = array<i64: 8, 32>}, {pipeline_mode = #tpu.pipeline_mode<synchronous>, transform_indices = @transform_1, window_bounds = array<i64: 32, 128>}, {pipeline_mode = #tpu.pipeline_mode<synchronous>, transform_indices = @transform_2, window_bounds = array<i64: 1, 128>}, {pipeline_mode = #tpu.pipeline_mode<synchronous>, transform_indices = @transform_3, window_bounds = array<i64: 128, 8>}, {pipeline_mode = #tpu.pipeline_mode<synchronous>, transform_indices = @transform_4, window_bounds = array<i64: 1, 8>}, {transform_indices = @transform_5, window_bounds = array<i64: 8, 8>}]} {
    %c0 = arith.constant 0 : index
    %c0_0 = arith.constant 0 : index
    %0 = vector.load %arg1[%c0, %c0_0] : memref<8x32xf32, #tpu.memory_space<vmem>>, vector<8x32xf32>
    %1 = arith.truncf %0 : vector<8x32xf32> to vector<8x32xbf16>
    %c0_1 = arith.constant 0 : index
    %c0_2 = arith.constant 0 : index
    %2 = vector.load %arg2[%c0_1, %c0_2] : memref<32x128xbf16, #tpu.memory_space<vmem>>, vector<32x128xbf16>
    %cst = arith.constant dense<0.000000e+00> : vector<8x128xf32>
    %3 = tpu.matmul %1, %2, %cst {dimension_numbers = #tpu.dot_dimension_numbers<[1], [0], [0], [1], [0, 0, 1, 1], [], []>} : vector<8x32xbf16>, vector<32x128xbf16>, vector<8x128xf32> -> vector<8x128xf32>
    %c0_3 = arith.constant 0 : index
    %c0_4 = arith.constant 0 : index
    %4 = vector.load %arg3[%c0_3, %c0_4] : memref<1x128xf32, #tpu.memory_space<vmem>>, vector<1x128xf32>
    %5 = vector.broadcast %4 : vector<1x128xf32> to vector<8x128xf32>
    %6 = arith.addf %3, %5 : vector<8x128xf32>
    %cst_5 = arith.constant 0.000000e+00 : f32
    %7 = vector.broadcast %cst_5 : f32 to vector<8x128xf32>
    %8 = arith.maximumf %6, %7 : vector<8x128xf32>
    %9 = arith.truncf %8 : vector<8x128xf32> to vector<8x128xbf16>
    %c0_6 = arith.constant 0 : index
    %c0_7 = arith.constant 0 : index
    %10 = vector.load %arg4[%c0_6, %c0_7] : memref<128x8xbf16, #tpu.memory_space<vmem>>, vector<128x8xbf16>
    %cst_8 = arith.constant dense<0.000000e+00> : vector<8x8xf32>
    %11 = tpu.matmul %9, %10, %cst_8 {dimension_numbers = #tpu.dot_dimension_numbers<[1], [0], [0], [1], [0, 0, 1, 1], [], []>} : vector<8x128xbf16>, vector<128x8xbf16>, vector<8x8xf32> -> vector<8x8xf32>
    %c0_9 = arith.constant 0 : index
    %c0_10 = arith.constant 0 : index
    %12 = vector.load %arg5[%c0_9, %c0_10] : memref<1x8xf32, #tpu.memory_space<vmem>>, vector<1x8xf32>
    %13 = vector.broadcast %12 : vector<1x8xf32> to vector<8x8xf32>
    %14 = arith.addf %11, %13 : vector<8x8xf32>
    %c0_11 = arith.constant 0 : index
    %c0_12 = arith.constant 0 : index
    %15 = vector.load %arg6[%c0_11, %c0_12] : memref<8x8xf32, #tpu.memory_space<vmem>>, vector<8x8xf32>
    tpu.vector_store %arg6[%c0_11, %c0_12], %14 {strides = array<i32>} : memref<8x8xf32, #tpu.memory_space<vmem>>, vector<8x8xf32>,
    return
  }
  func.func @transform_0(%arg0: i32) -> (i32, i32) {
    %c0_i32 = arith.constant 0 : i32
    %c0_i32_0 = arith.constant 0 : i32
    return %arg0, %c0_i32 : i32, i32
  }
  func.func @transform_1(%arg0: i32) -> (i32, i32) {
    %c0_i32 = arith.constant 0 : i32
    %c0_i32_0 = arith.constant 0 : i32
    %c0_i32_1 = arith.constant 0 : i32
    return %c0_i32, %c0_i32_0 : i32, i32
  }
  func.func @transform_2(%arg0: i32) -> (i32, i32) {
    %c0_i32 = arith.constant 0 : i32
    %c0_i32_0 = arith.constant 0 : i32
    %c0_i32_1 = arith.constant 0 : i32
    return %c0_i32, %c0_i32_0 : i32, i32
  }
  func.func @transform_3(%arg0: i32) -> (i32, i32) {
    %c0_i32 = arith.constant 0 : i32
    %c0_i32_0 = arith.constant 0 : i32
    %c0_i32_1 = arith.constant 0 : i32
    return %c0_i32, %c0_i32_0 : i32, i32
  }
  func.func @transform_4(%arg0: i32) -> (i32, i32) {
    %c0_i32 = arith.constant 0 : i32
    %c0_i32_0 = arith.constant 0 : i32
    %c0_i32_1 = arith.constant 0 : i32
    return %c0_i32, %c0_i32_0 : i32, i32
  }
  func.func @transform_5(%arg0: i32) -> (i32, i32) {
    %c0_i32 = arith.constant 0 : i32
    %c0_i32_0 = arith.constant 0 : i32
    return %arg0, %c0_i32 : i32, i32
  }
}

</mosaic_0001>

<bundles_post_ra>
// kernel: base_classifier_forward.1
= control target key start
LH: loop header
LB: loop body
LE: loop exit
PB: predicated region body
PF: predicated region fallthrough
CT: control target
= control target key end

     0   :  { %s580_s18 = smov 0   ;;  %s640_s0 = inlined_call_operand.vmem [shape: f32[16,32], index: 0, kind: input, shape index: {}]   ;;  %s641_s1 = inlined_call_operand.vmem [shape: bf16[32,128], index: 1, kind: input, shape index: {}]   ;;  %s642_s2 = inlined_call_operand.vmem [shape: f32[1,128], index: 2, kind: input, shape index: {}]   ;;  %s643_s3 = inlined_call_operand.vmem [shape: bf16[128,8], index: 3, kind: input, shape index: {}]   ;;  %s644_s4 = inlined_call_operand.vmem [shape: f32[1,8], index: 4, kind: input, shape index: {}]   ;;  %s645_s5 = inlined_call_operand.vmem [shape: f32[16,8], index: 5, kind: output, shape index: {}]  }
   0x1 LB: > { %s458_s19 = sadd.s32 4294967295, %s546_s18   ;;  %p462_p0 = scmp.ge.s32.totalorder %s546_s18, 1  ;;  %s546_s18 = sphi %s580_s18, %s15_s18  }
   0x2   : > { %p186_p1 = scmp.lt.s32.totalorder %s546_s18, 3 }
   0x4   : > { %p187_p2 = pnand %p462_p0, %p186_p1 }
   0x5   : > { %v530_v0 = vld [vmem:[%s641_s1] sm:$0xff] (!%p187_p2)   ;;  %v548_v1 = vmov (!%p187_p2), 0.0   ;;  %v531_v2 = vld [vmem:[%s641_s1 + $0x8] sm:$0xff] (!%p187_p2)   ;;  %vm549_vm0 = vmmov (!%p187_p2), 0   ;;  %p212_p3 = scmp.lt.s32.totalorder (!%p187_p2), %s458_s19, 1  ;;  %vm246_vm1 = vcmask (!%p187_p2), 261120  }
   0x6   : > { %190 = sbr.rel (%p187_p2) target bundleno = 452 (0x1c4), region = 40  ;;  %492 = vmatprep.subr.bf16.mxu0 (!%p187_p2), %v548_v1  ;;  %500 = vmatprep.subr.bf16.mxu1 (!%p187_p2), %v548_v1  ;;  %v532_v3 = vld [vmem:[%s643_s3] sm:$0xff] (!%p187_p2)   ;;  %v533_v4 = vld [vmem:[%s643_s3 + $0x8] sm:$0xff] (!%p187_p2)   ;;  %v534_v6 = vld [vmem:[%s643_s3 + $0x10] sm:$0xff] (!%p187_p2)   ;;  %vm403_vm2 = vcmask (!%p187_p2), 64512  }
   0x7   : > { %493 = vmatpush3.bf16.msra.mxu0 (!%p187_p2), %v530_v0  ;;  %496 = vmatprep.mubr.msk.bf16.mxu0 (!%p187_p2), %vm549_vm0, %v548_v1  ;;  %v535_v8 = vld [vmem:[%s643_s3 + $0x18] sm:$0xff] (!%p187_p2)   ;;  %v536_v9 = vld [vmem:[%s643_s3 + $0x20] sm:$0xff] (!%p187_p2)   ;;  %v537_v10 = vld [vmem:[%s643_s3 + $0x28] sm:$0xff] (!%p187_p2)  }
   0x8   : > { %494 = vmatprep.subr.bf16.mxu0 (!%p187_p2), %v548_v1  ;;  %516 = vmatprep.mubr.msk.bf16.mxu1 (!%p187_p2), %vm549_vm0, %v548_v1  ;;  %v538_v11 = vld [vmem:[%s643_s3 + $0x30] sm:$0xff] (!%p187_p2)   ;;  %v539_v12 = vld [vmem:[%s643_s3 + $0x38] sm:$0xff] (!%p187_p2)   ;;  %v465_v13 = vld [vmem:[%s642_s2] ss:$0 sm:$0xff] (!%p187_p2) }
   0x9   : > { %501 = vmatpush3.bf16.msra.mxu1 (!%p187_p2), %v532_v3  ;;  %v469_v21 = vld [vmem:[%s644_s4] ss:$0 sm:$0xff] (!%p187_p2) }
   0xa   : > { %502 = vmatprep.subr.bf16.mxu1 (!%p187_p2), %v548_v1 }
   0xb   : > { %495 = vmatpush3.bf16.msra.mxu0 (!%p187_p2), %v531_v2 }
   0xd   : > { %s647_s19 = smov (!%p212_p3, %s458_s19), 1  ;;  %503 = vmatpush3.bf16.msra.mxu1 %v533_v4 }
   0xe   : > { %s463_s28 = sshll.u32 %s647_s19, 3  ;;  %504 = vmatprep.subr.bf16.mxu1 %v548_v1 }
   0xf   : > { %s215_s6 = scalar_lea.vmem %s640_s0, %s463_s28  ;;  %s219_s27 = scalar_lea.vmem %s645_s5, %s463_s28 }
  0x10   : > { %v221_v5 = vld [vmem:[%s215_s6] sm:$0xff] }
  0x11   : > { %v222_v7 = vpack.c.bf16 %v221_v5, %v221_v5  ;;  %505 = vmatpush3.bf16.msra.mxu1 %v534_v6 }
  0x12   : > { %506 = vmatprep.subr.bf16.mxu1 %v548_v1 }
  0x13   : > { %497 = vmatmul.mubr.msk.bf16.vlgmr.msra.gmra.mrb[0].mxu0 %vm246_vm1, %v222_v7 }
  0x15   : > { %507 = vmatpush3.bf16.msra.mxu1 %v535_v8 }
  0x16   : > { %508 = vmatprep.subr.bf16.mxu1 %v548_v1 }
  0x19   : > { %509 = vmatpush3.bf16.msra.mxu1 %v536_v9 }
  0x1a   : > { %510 = vmatprep.subr.bf16.mxu1 %v548_v1 }
  0x1d   : > { %511 = vmatpush3.bf16.msra.mxu1 %v537_v10 }
  0x1e   : > { %512 = vmatprep.subr.bf16.mxu1 %v548_v1 }
  0x21   : > { %513 = vmatpush3.bf16.msra.mxu1 %v538_v11 }
  0x22   : > { %514 = vmatprep.subr.bf16.mxu1 %v548_v1 }
  0x25   : > { %515 = vmatpush3.bf16.msra.mxu1 %v539_v12 }
  0xe6   : > { %v284_v14 = vpop.f32.mrb[0].mxu0 }
  0xe7   : > { %v285_v15 = vadd.f32 %v465_v13, %v284_v14  ;;  %v498_v16 = vpop.f32.mrb[1].mxu0 }
  0xe8   : > { %v287_v17 = vpop.f32.mrb[2].mxu0 }
  0xe9   : > { %v290_v18 = vmax.f32 %v285_v15, 0.0  ;;  %v499_v19 = vpop.f32.mrb[3].mxu0 }
  0xeb   : > { %v291_v20 = vpack.c.bf16 %v290_v18, %v290_v18 }
  0xed   : > { %517 = vmatmul.mubr.bf16.vlgmr.msra.gmra.mrb[0].mxu1 %v291_v20 }
 0x1c0   : > { %v397_v22 = vpop.f32.mrb[0].mxu1 }
 0x1c1   : > { %v398_v23 = vadd.f32 %v469_v21, %v397_v22  ;;  %v518_v24 = vpop.f32.mrb[1].mxu1 }
 0x1c2   : > { %v400_v25 = vpop.f32.mrb[2].mxu1 }
 0x1c3   : > { %404 = vst.msk [vmem:[%s219_s27] sm:$0xff] %vm403_vm2, %v398_v23  ;;  %v519_v26 = vpop.f32.mrb[3].mxu1 }
 0x1c4 PF: > { %s15_s18 = sadd.s32 1, %s546_s18  }
 0x1c5   : > { %p12_p4 = scmp.ge.s32.totalorder %s15_s18, 4  }
 0x1c7   :  { %14 = sbr.rel (!%p12_p4) target bundleno = 1 (0x1), region = 70 }

</bundles_post_ra>
